<compile_context>
chip_gen: v7x
topology: tpu7x:2x2x1
jax: 0.10.0
libtpu: 0.0.40
codegen_flags: <defaults>
</compile_context>

<pallas_src>
import jax
import jax.numpy as jnp
from jax import lax
from jax.experimental import pallas as pl
from jax.experimental.pallas import tpu as pltpu


def _interconv_kernel(x_ref, w_ref, b_ref, out_ref):
    """One (batch-tile, N-tile) block.

    x_ref:   (Bt, K)    flattened field embeddings (K = F*E)
    w_ref:   (K,  Tn)   combined (pair-select x conv) weight tile
    b_ref:   (1,  Tn)   bias replicated per pair (b_flat[c*P+p] = bias[c])
    out_ref: (Bt, Tn)   per-row slice of the row-major (C,P) conv map
    """
    acc = jnp.dot(x_ref[...], w_ref[...], preferred_element_type=jnp.float32)
    acc = acc + b_ref[...]                          # broadcast (1, Tn)
    out_ref[...] = jnp.maximum(acc, 0.0).astype(out_ref.dtype)


def _pair_indices(num_fields):
    i_idx, j_idx = [], []
    for i in range(num_fields - 1):
        for j in range(i + 1, num_fields):
            i_idx.append(i)
            j_idx.append(j)
    return i_idx, j_idx


def _round_up(x, m):
    return ((x + m - 1) // m) * m


def _build_combined_params(weight, bias, F, E, C):
    """Fold pair selection + conv kernel into one (F*E, C*P) weight."""
    i_idx, j_idx = _pair_indices(F)
    P = len(i_idx)
    w0 = weight[:, 0, 0, :]                         # (C, E)
    w1 = weight[:, 0, 1, :]                         # (C, E)
    si = jnp.zeros((P, F), w0.dtype).at[jnp.arange(P), jnp.array(i_idx)].set(1.0)
    sj = jnp.zeros((P, F), w1.dtype).at[jnp.arange(P), jnp.array(j_idx)].set(1.0)
    # Wc[f*E+e, c*P+p] = Si[p,f]*W0[c,e] + Sj[p,f]*W1[c,e]
    wc = (jnp.einsum('pf,ce->fecp', si, w0)
          + jnp.einsum('pf,ce->fecp', sj, w1)).reshape(F * E, C * P)
    b_flat = jnp.repeat(bias, P).reshape(1, C * P)  # b_flat[0, c*P+p] = bias[c]
    return wc, b_flat, P


def interconv_forward(x_emb, weight, bias, conv_size, batch_tile=None, n_tile=None):
    """x_emb: (B,F,E). weight: (C,1,2,E). bias: (C,). Returns (B, P, C)."""
    B, F, E = x_emb.shape
    C = conv_size
    wc, b_flat, P = _build_combined_params(weight, bias, F, E, C)
    K = F * E                                       # matmul reduction dim
    N = C * P                                       # logical output width
    itemsize = jnp.dtype(x_emb.dtype).itemsize

    # ---- lane-dense output width: pad N to a multiple of the N-tile (128-aligned)
    if n_tile is None:
        tn = min(_round_up(N, 128), 2048)
    else:
        tn = _round_up(max(128, int(n_tile)), 128)
    n_pad = _round_up(max(N, tn), tn)
    n_tiles = n_pad // tn
    if n_pad != N:
        wc = jnp.pad(wc, ((0, 0), (0, n_pad - N)))
        b_flat = jnp.pad(b_flat, ((0, 0), (0, n_pad - N)))

    # ---- batch tile sizing (VMEM-aware; v7x only has 64 MiB physical)
    budget = 24 * 2**20                             # double-buffered working set
    fixed = (K * tn + tn) * itemsize                # weight + bias tiles
    per_row = (K + tn) * itemsize                   # x row + out row
    if batch_tile is None:
        bt = (budget // 2 - fixed) // max(1, per_row)
        bt = max(8, min(1024, int(bt)))
    else:
        bt = max(8, int(batch_tile))
    num_b_tiles = -(-B // bt)                       # cdiv
    bt = -(-B // num_b_tiles)                       # rebalance across tiles
    bt = _round_up(bt, 8)                           # sublane multiple
    b_pad = num_b_tiles * bt

    # flatten fields into the reduction dim (free reshape) + pad batch
    x2 = x_emb.reshape(B, K)
    if b_pad != B:
        x2 = jnp.pad(x2, ((0, b_pad - B), (0, 0)))

    vmem_est = 2 * (bt * K + K * tn + tn + bt * tn) * itemsize
    vmem_limit = int(min(60 * 2**20, max(32 * 2**20, 2 * vmem_est)))

    out_flat = pl.pallas_call(
        _interconv_kernel,
        out_shape=jax.ShapeDtypeStruct((b_pad, n_pad), x_emb.dtype),
        grid_spec=pltpu.PrefetchScalarGridSpec(
            num_scalar_prefetch=0,
            grid=(b_pad // bt, n_tiles),
            in_specs=[
                pl.BlockSpec((bt, K), lambda i, j: (i, 0)),   # batch-tiled input
                pl.BlockSpec((K, tn), lambda i, j: (0, j)),   # weight N-tile
                pl.BlockSpec((1, tn), lambda i, j: (0, j)),   # bias N-tile
            ],
            out_specs=pl.BlockSpec((bt, tn), lambda i, j: (i, j)),
        ),
        compiler_params=pltpu.CompilerParams(
            dimension_semantics=("parallel", "parallel"),
            vmem_limit_bytes=vmem_limit,
        ),
        cost_estimate=pl.CostEstimate(
            flops=2 * b_pad * K * n_pad,
            transcendentals=0,
            bytes_accessed=(b_pad * K + K * n_pad + n_pad + b_pad * n_pad) * itemsize,
        ),
    )(x2, wc, b_flat)

    out_flat = out_flat[:B, :N]                     # drop batch / lane padding
    # torch's `.view(B, -1, C)` on contiguous (B, C, P, 1) is a raw row-major
    # reinterpretation; our rows are already (C,P) row-major -> pure reshape.
    return out_flat.reshape(B, P, C)


def _reference(x_emb, weight, bias, conv_size):
    """Pure-JAX reference of the PyTorch forward (sanity check)."""
    B, F, E = x_emb.shape
    C = conv_size
    rows = []
    for i in range(F - 1):
        for j in range(i + 1, F):
            rows.append(x_emb[:, i])
            rows.append(x_emb[:, j])
    stacked = jnp.stack(rows, axis=1)[:, None]              # (B, 1, 2P, E)
    out = lax.conv_general_dilated(
        stacked, weight, window_strides=(2, 1), padding="VALID",
        dimension_numbers=("NCHW", "OIHW", "NCHW"))          # (B, C, P, 1)
    out = out + bias.reshape(1, C, 1, 1)
    out = jnp.maximum(out, 0.0)
    return out.reshape(B, -1, C)


if __name__ == "__main__":
    B, F, E = 2, 4, 32          # batch, num_fields, embed_dim
    C = 8                       # conv_size
    key = jax.random.PRNGKey(0)
    kx, kw, kb = jax.random.split(key, 3)
    x_emb = jax.random.normal(kx, (B, F, E), dtype=jnp.float32)
    weight = jax.random.normal(kw, (C, 1, 2, E), dtype=jnp.float32) * 0.1
    bias = jax.random.normal(kb, (C,), dtype=jnp.float32) * 0.1

    out = interconv_forward(x_emb, weight, bias, C)
    out = jax.block_until_ready(out)

    ref = _reference(x_emb, weight, bias, C)
    assert out.shape == ref.shape, (out.shape, ref.shape)
    assert jnp.allclose(out, ref, atol=1e-5, rtol=1e-5), "mismatch vs reference"

    print("KERNEL_OK")
</pallas_src>

<mosaic_0001>
module attributes {stable_mosaic.version = 11 : i64} {
  func.func @_interconv_kernel(%arg0: i32, %arg1: i32, %arg2: memref<8x128xf32, #tpu.memory_space<vmem>>, %arg3: memref<128x128xf32, #tpu.memory_space<vmem>>, %arg4: memref<1x128xf32, #tpu.memory_space<vmem>>, %arg5: memref<8x128xf32, #tpu.memory_space<vmem>>) attributes {dimension_semantics = [#tpu.dimension_semantics<parallel>, #tpu.dimension_semantics<parallel>], iteration_bounds = array<i64: 1, 1>, scalar_prefetch = 0 : i64, scratch_operands = 0 : i64, tpu.core_type = #tpu.core_type<tc>, window_params = [{transform_indices = @transform_0, window_bounds = array<i64: 8, 128>}, {transform_indices = @transform_1, window_bounds = array<i64: 128, 128>}, {transform_indices = @transform_2, window_bounds = array<i64: 1, 128>}, {transform_indices = @transform_3, window_bounds = array<i64: 8, 128>}]} {
    %c0 = arith.constant 0 : index
    %c0_0 = arith.constant 0 : index
    %0 = vector.load %arg2[%c0, %c0_0] : memref<8x128xf32, #tpu.memory_space<vmem>>, vector<8x128xf32>
    %c0_1 = arith.constant 0 : index
    %c0_2 = arith.constant 0 : index
    %1 = vector.load %arg3[%c0_1, %c0_2] : memref<128x128xf32, #tpu.memory_space<vmem>>, vector<128x128xf32>
    %cst = arith.constant dense<0.000000e+00> : vector<8x128xf32>
    %2 = tpu.matmul %0, %1, %cst {dimension_numbers = #tpu.dot_dimension_numbers<[1], [0], [0], [1], [0, 0, 1, 1], [], []>} : vector<8x128xf32>, vector<128x128xf32>, vector<8x128xf32> -> vector<8x128xf32>
    %c0_3 = arith.constant 0 : index
    %c0_4 = arith.constant 0 : index
    %3 = vector.load %arg4[%c0_3, %c0_4] : memref<1x128xf32, #tpu.memory_space<vmem>>, vector<1x128xf32>
    %4 = vector.broadcast %3 : vector<1x128xf32> to vector<8x128xf32>
    %5 = arith.addf %2, %4 : vector<8x128xf32>
    %cst_5 = arith.constant 0.000000e+00 : f32
    %6 = vector.broadcast %cst_5 : f32 to vector<8x128xf32>
    %7 = arith.maximumf %5, %6 : vector<8x128xf32>
    %c0_6 = arith.constant 0 : index
    %c0_7 = arith.constant 0 : index
    %8 = vector.load %arg5[%c0_6, %c0_7] : memref<8x128xf32, #tpu.memory_space<vmem>>, vector<8x128xf32>
    tpu.vector_store %arg5[%c0_6, %c0_7], %7 {strides = array<i32>} : memref<8x128xf32, #tpu.memory_space<vmem>>, vector<8x128xf32>,
    return
  }
  func.func @transform_0(%arg0: i32, %arg1: i32) -> (i32, i32) {
    %c0_i32 = arith.constant 0 : i32
    %c0_i32_0 = arith.constant 0 : i32
    return %arg0, %c0_i32 : i32, i32
  }
  func.func @transform_1(%arg0: i32, %arg1: i32) -> (i32, i32) {
    %c0_i32 = arith.constant 0 : i32
    %c0_i32_0 = arith.constant 0 : i32
    return %c0_i32, %arg1 : i32, i32
  }
  func.func @transform_2(%arg0: i32, %arg1: i32) -> (i32, i32) {
    %c0_i32 = arith.constant 0 : i32
    %c0_i32_0 = arith.constant 0 : i32
    return %c0_i32, %arg1 : i32, i32
  }
  func.func @transform_3(%arg0: i32, %arg1: i32) -> (i32, i32) {
    %c0_i32 = arith.constant 0 : i32
    return %arg0, %arg1 : i32, i32
  }
}

</mosaic_0001>

<bundles_post_ra>
// kernel: tpu_custom_call.1
= control target key start
LH: loop header
LB: loop body
LE: loop exit
PB: predicated region body
PF: predicated region fallthrough
CT: control target
= control target key end

     0   :  { %8 = vsyncpa [#allocation3], 0  ;;  %s384_s0 = inlined_call_operand.hbm [shape: f32[8,128], index: 0, kind: input, shape index: {}]   ;;  %s385_s1 = inlined_call_operand.hbm [shape: f32[128,128], index: 1, kind: input, shape index: {}]   ;;  %s386_s2 = inlined_call_operand.vmem [shape: f32[1,128], index: 2, kind: input, shape index: {}]   ;;  %s387_s3 = inlined_call_operand.hbm [shape: f32[8,128], index: 3, kind: output, shape index: {}]  }
   0x1   :  { %9 = vsyncpa [#allocation6], 0 }
   0x2   :  { %10 = vsyncpa [#allocation4], 0  ;;  %s310_s12 = smov [#allocation2]   ;;  %s311_s14 = smov [#allocation5]  }
   0x3   :  { %s17_s13 = sshll.u32 %s310_s12, 4  ;;  %s26_s15 = sshll.u32 %s311_s14, 4  ;;  %s18_s13 = int_to_ptr.vmem [resolvable:$true] %s17_s13  ;;  %s338_s15 = int_to_ptr.vmem [resolvable:$true] %s26_s15 }
   0x4   :  { %s238_s18 = scalar_lea.hbm %s384_s0, 128 }
   0x5   :  { %p239_p0 = scmp.ne.s32.totalorder %s384_s0, %s238_s18  ;;  %p242_p1 = scmp.lt.u32.totalorder %s238_s18, %s384_s0 }
   0x7   :  { %p244_p2 = pnand %p242_p1, %p239_p0 }
   0x9   :  { %247 = shalt.err (!%p244_p2)
}
   0xa   :  { %s248_s23 = scalar_lea.vmem %s18_s13, 128  ;;  %p253_p4 = scmp.lt.s32.totalorder %s18_s13, %s18_s13 }
   0xb   :  { %p249_p3 = scmp.ne.s32.totalorder %s18_s13, %s248_s23  ;;  %p254_p5 = scmp.lt.s32.totalorder %s248_s23, %s248_s23 }
   0xd   :  { %p255_p6 = por %p254_p5, %p253_p4 }
   0xf   :  { %p256_p7 = pnand %p255_p6, %p249_p3 }
  0x11   :  { %259 = shalt.err (!%p256_p7)
}
  0x12   :  { %20 = dma.hbm_to_vmem [thread:$0]  %s384_s0, 128, %s18_s13, [#allocation3]  }
  0x13   :  { %s260_s28 = scalar_lea.hbm %s385_s1, 2048 }
  0x14   :  { %p261_p8 = scmp.ne.s32.totalorder %s385_s1, %s260_s28  ;;  %p264_p9 = scmp.lt.u32.totalorder %s260_s28, %s385_s1 }
  0x16   :  { %p266_p10 = pnand %p264_p9, %p261_p8 }
  0x18   :  { %269 = shalt.err (!%p266_p10)
}
  0x19   :  { %s270_s6 = scalar_lea.vmem %s338_s15, 2048  ;;  %p275_p12 = scmp.lt.s32.totalorder %s338_s15, %s338_s15 }
  0x1a   :  { %p271_p11 = scmp.ne.s32.totalorder %s338_s15, %s270_s6  ;;  %p276_p13 = scmp.lt.s32.totalorder %s270_s6, %s270_s6 }
  0x1c   :  { %p277_p0 = por %p276_p13, %p275_p12 }
  0x1e   :  { %p278_p1 = pnand %p277_p0, %p271_p11 }
  0x20   :  { %281 = shalt.err (!%p278_p1)
}
  0x21   :  { %s312_s0 = smov 128   ;;  %s313_s7 = smov 8  }
  0x22   :  { %32 = dma.hbm_to_vmem [thread:$0]  %s385_s1, 2048, %s338_s15, [#allocation6], %s312_s0, %s312_s0, %s313_s7  }
  0x23   :  { %304 = dma.done.wait [#allocation3], 128  }
  0x24   :  { %305 = vsyncadd [#allocation3], 4294967168 }
  0x25   :  { %306 = dma.done.wait [#allocation6], 2048  }
  0x26   :  { %307 = vsyncadd [#allocation6], 4294965248  ;;  %v314_v0 = vmov 0.0|0.0   ;;  %vm315_vm0 = vmmov 0   ;;  %v316_v1 = vmov 0.0   ;;  %v42_v2 = vld [vmem:[#allocation5] sm:$0xff] }
  0x27   :  { %206 = vmatprep.subr.bf16.mxu0 %v314_v0  ;;  %203 = vmatprep.mubr.msk.f32.mxu0 %vm315_vm0, %v316_v1  ;;  %v43_v3 = vld [vmem:[#allocation5 + $0x8] sm:$0xff]  ;;  %v44_v4 = vld [vmem:[#allocation5 + $0x10] sm:$0xff]  ;;  %v45_v6 = vld [vmem:[#allocation5 + $0x18] sm:$0xff]  ;;  %s317_s11 = smov [#allocation7]  }
  0x28   :  { %v207_v5 = vpack.c.bf16 %v43_v3, %v42_v2  ;;  %v210_v7 = vpack.c.bf16 %v45_v6, %v44_v4  ;;  %v46_v8 = vld [vmem:[#allocation5 + $0x20] sm:$0xff]  ;;  %v47_v9 = vld [vmem:[#allocation5 + $0x28] sm:$0xff]  ;;  %v48_v11 = vld [vmem:[#allocation5 + $0x30] sm:$0xff]  ;;  %s143_s12 = sshll.u32 %s317_s11, 4  ;;  %s144_s12 = int_to_ptr.vmem [resolvable:$true] %s143_s12 }
  0x29   :  { %v213_v10 = vpack.c.bf16 %v47_v9, %v46_v8  ;;  %v49_v12 = vld [vmem:[#allocation5 + $0x38] sm:$0xff]  ;;  %v50_v14 = vld [vmem:[#allocation5 + $0x40] sm:$0xff]  ;;  %v51_v15 = vld [vmem:[#allocation5 + $0x48] sm:$0xff]  ;;  %s282_s13 = scalar_lea.vmem %s144_s12, 128  ;;  %p287_p3 = scmp.lt.s32.totalorder %s144_s12, %s144_s12 }
  0x2a   :  { %208 = vmatpush3.bf16.msra.mxu0 %v207_v5  ;;  %v216_v13 = vpack.c.bf16 %v49_v12, %v48_v11  ;;  %v219_v16 = vpack.c.bf16 %v51_v15, %v50_v14  ;;  %v52_v17 = vld [vmem:[#allocation5 + $0x50] sm:$0xff]  ;;  %v53_v18 = vld [vmem:[#allocation5 + $0x58] sm:$0xff]  ;;  %v54_v20 = vld [vmem:[#allocation5 + $0x60] sm:$0xff]  ;;  %p283_p2 = scmp.ne.s32.totalorder %s144_s12, %s282_s13  ;;  %p288_p4 = scmp.lt.s32.totalorder %s282_s13, %s282_s13 }
  0x2b   :  { %209 = vmatprep.subr.bf16.mxu0 %v314_v0  ;;  %v222_v19 = vpack.c.bf16 %v53_v18, %v52_v17  ;;  %v55_v21 = vld [vmem:[#allocation5 + $0x68] sm:$0xff]  ;;  %v56_v23 = vld [vmem:[#allocation5 + $0x70] sm:$0xff]  ;;  %v57_v24 = vld [vmem:[#allocation5 + $0x78] sm:$0xff] }
  0x2c   :  { %v225_v22 = vpack.c.bf16 %v55_v21, %v54_v20  ;;  %v228_v25 = vpack.c.bf16 %v57_v24, %v56_v23  ;;  %v41_v26 = vld [vmem:[#allocation2] sm:$0xff]  ;;  %p289_p5 = por %p288_p4, %p287_p3 }
  0x2d   :  { %v153_v27 = vld [vmem:[%s386_s2] ss:$0 sm:$0xff] }
  0x2e   :  { %211 = vmatpush3.bf16.msra.mxu0 %v210_v7  ;;  %p290_p6 = pnand %p289_p5, %p283_p2 }
  0x2f   :  { %212 = vmatprep.subr.bf16.mxu0 %v314_v0 }
  0x32   :  { %214 = vmatpush3.bf16.msra.mxu0 %v213_v10 }
  0x33   :  { %215 = vmatprep.subr.bf16.mxu0 %v314_v0 }
  0x36   :  { %217 = vmatpush3.bf16.msra.mxu0 %v216_v13 }
  0x37   :  { %218 = vmatprep.subr.bf16.mxu0 %v314_v0 }
  0x3a   :  { %220 = vmatpush3.bf16.msra.mxu0 %v219_v16 }
  0x3b   :  { %221 = vmatprep.subr.bf16.mxu0 %v314_v0 }
  0x3e   :  { %223 = vmatpush3.bf16.msra.mxu0 %v222_v19 }
  0x3f   :  { %224 = vmatprep.subr.bf16.mxu0 %v314_v0 }
  0x42   :  { %226 = vmatpush3.bf16.msra.mxu0 %v225_v22 }
  0x43   :  { %227 = vmatprep.subr.bf16.mxu0 %v314_v0 }
  0x46   :  { %229 = vmatpush3.bf16.msra.mxu0 %v228_v25 }
  0x49   :  { %204 = vmatmul.mubr.f32.vlgmr.msra.gmra.mrb[0].mxu0 %v41_v26 }
 0x11c   :  { %v131_v28 = vpop.f32.mrb[0].mxu0 }
 0x11d   :  { %v132_v29 = vadd.f32 %v153_v27, %v131_v28  ;;  %v205_v30 = vpop.f32.mrb[1].mxu0 }
 0x11f   :  { %v135_v31 = vmax.f32 %v132_v29, 0.0 }
 0x121   :  { %136 = vst [vmem:[#allocation7] sm:$0xff] %v135_v31 }
 0x122   :  { %293 = shalt.err (!%p290_p6)
}
 0x123   :  { %s294_s16 = scalar_lea.hbm %s387_s3, 128 }
 0x124   :  { %p295_p7 = scmp.ne.s32.totalorder %s387_s3, %s294_s16  ;;  %p298_p8 = scmp.lt.u32.totalorder %s294_s16, %s387_s3 }
 0x126   :  { %p300_p9 = pnand %p298_p8, %p295_p7 }
 0x128   :  { %303 = shalt.err (!%p300_p9)
}
 0x129   :  { %146 = dma.vmem_to_hbm [thread:$0]  %s144_s12, 128, %s387_s3, [#allocation4]  }
 0x12a   :  { %308 = dma.done.wait [#allocation4], 128  }
 0x12b   :  { %309 = vsyncadd [#allocation4], 4294967168 }
 0x12c   :  { %150 = vsyncpa [#allocation3], 1 }
 0x12d   :  { %151 = vsyncpa [#allocation6], 1 }
 0x12e   :  { %152 = vsyncpa [#allocation4], 1 }

</bundles_post_ra>
